<compile_context>
chip_gen: v5e
topology: v5e:2x2
jax: 0.10.0
libtpu: 0.0.40
codegen_flags: <defaults>
</compile_context>

<pallas_src>
import jax
import jax.numpy as jnp
from jax import lax
from jax.experimental import pallas as pl
from jax.experimental.pallas import tpu as pltpu


def _round_up(x: int, m: int) -> int:
    return ((x + m - 1) // m) * m


# ============================================================================
# Kernel 1:  HW2s = d_r * ( relu( d_r * (A @ Xs) @ W1 + b1 ) @ W2 )
#   where Xs = d * X was pre-scaled in the wrapper, so d_r*(A@Xs) == A_hat @ X.
#   grid = (row_tiles [parallel], k_tiles over A columns [arbitrary])
# ============================================================================
def enc1_kernel(a_ref, dr_ref, xs_ref, w1_ref, b1_ref, w2_ref,
                hw2s_ref, acc_ref):
    k = pl.program_id(1)
    t = a_ref.shape[0]

    @pl.when(k == 0)
    def _():
        acc_ref[...] = jnp.zeros_like(acc_ref)

    # raw bf16 A tile straight into the MXU; Xs is VMEM-resident, slice K chunk
    off = pl.multiple_of(k * t, t)
    acc_ref[...] += jnp.dot(a_ref[...], xs_ref[pl.ds(off, t), :],
                            preferred_element_type=jnp.float32)

    @pl.when(k == pl.num_programs(1) - 1)
    def _():
        dr = dr_ref[...]                                   # (t,1) f32
        ax = (dr * acc_ref[...]).astype(jnp.bfloat16)      # == A_hat @ X
        h = jnp.dot(ax, w1_ref[...], preferred_element_type=jnp.float32)
        h = jnp.maximum(h + b1_ref[...], 0.0)              # ReLU in f32
        # Dropout(0.1) is identity at inference.
        # TODO(synk): training-mode dropout (stochastic masking) omitted.
        hw2 = jnp.dot(h.astype(jnp.bfloat16), w2_ref[...],
                      preferred_element_type=jnp.float32)
        # pre-scale by d_r so kernel 2 can stream A @ (d*HW2) with no per-tile
        # normalization (padded rows have d_r == 0 -> exact zeros).
        hw2s_ref[...] = (dr * hw2).astype(hw2s_ref.dtype)


# ============================================================================
# Kernel 2:  Z = d_r * (A @ HW2s) + b2 ;  X_rec = relu(Z Wd1 + bd1) Wd2 + bd2
#   grid = (row_tiles [parallel], k_tiles over A columns [arbitrary])
# ============================================================================
def enc2_nodedec_kernel(a_ref, dr_ref, hw2s_ref,
                        b2_ref, wd1_ref, bd1_ref, wd2_ref, bd2_ref,
                        z_ref, zb_ref, xrec_ref, acc_ref):
    k = pl.program_id(1)
    t = a_ref.shape[0]

    @pl.when(k == 0)
    def _():
        acc_ref[...] = jnp.zeros_like(acc_ref)

    off = pl.multiple_of(k * t, t)
    acc_ref[...] += jnp.dot(a_ref[...], hw2s_ref[pl.ds(off, t), :],
                            preferred_element_type=jnp.float32)

    @pl.when(k == pl.num_programs(1) - 1)
    def _():
        z = dr_ref[...] * acc_ref[...] + b2_ref[...]       # == A_hat@HW2 + b2
        z_ref[...] = z.astype(z_ref.dtype)
        zb_ref[...] = z.astype(zb_ref.dtype)               # bf16 copy for kernel 3
        d = jnp.dot(z.astype(jnp.bfloat16), wd1_ref[...],
                    preferred_element_type=jnp.float32)
        d = jnp.maximum(d + bd1_ref[...], 0.0)             # ReLU in f32
        # Dropout(0.1) identity at inference.
        xrec_ref[...] = (jnp.dot(d.astype(jnp.bfloat16), wd2_ref[...],
                                 preferred_element_type=jnp.float32)
                         + bd2_ref[...]).astype(xrec_ref.dtype)


# ============================================================================
# Kernel 3 (edge decoder): adj_recon = sigmoid(Z @ Z^T), bf16 (t,t) output tiles,
# Z VMEM-resident in bf16, row/col tiles sliced in-kernel.
# ============================================================================
def edge_dec_kernel(zb_ref, adj_ref):
    i = pl.program_id(0)
    j = pl.program_id(1)
    t = adj_ref.shape[0]
    zr = zb_ref[pl.ds(pl.multiple_of(i * t, t), t), :]
    zc = zb_ref[pl.ds(pl.multiple_of(j * t, t), t), :]
    # contract last dim with last dim -> no XLU transpose of Z before the MXU
    logits = lax.dot_general(zr, zc,
                             dimension_numbers=(((1,), (1,)), ((), ())),
                             preferred_element_type=jnp.float32)
    # sigmoid via EUP exp + approx EUP reciprocal (cheap on the non-MXU slots)
    e = jnp.exp(-logits)
    adj_ref[...] = pl.reciprocal(1.0 + e, approx=True).astype(adj_ref.dtype)


# ============================================================================
# Wrapper
# ============================================================================
def graph_autoencoder_forward(x, edge_index, params, *, max_tile=512,
                              vmem_limit_bytes=48 * 1024 * 1024):
    n, f = x.shape
    h_dim = params["w1"].shape[1]
    e_dim = params["w2"].shape[1]

    # ---- graph glue in XLA: dense A(+I) and symmetric-norm degree vector -----
    src, dst = edge_index[0], edge_index[1]
    adj = jnp.zeros((n, n), jnp.float32).at[src, dst].set(1.0)
    adj = adj.at[jnp.arange(n), jnp.arange(n)].set(1.0)
    deg = adj.sum(axis=1)
    d_inv_sqrt = jnp.where(deg > 0, lax.rsqrt(deg), 0.0)

    # Fold the column-side normalization into X once (f32, outside the K-loop).
    x_scaled = x * d_inv_sqrt[:, None]

    # ---- tiling: lane-dense 128-multiples; prefer >=2 row tiles (v7x 2 TCs) ---
    n128 = _round_up(n, 128)
    t = min(max_tile, n128)
    if n128 >= 256 and n128 // t < 2:
        t = max(128, _round_up(n128 // 2, 128))
    n_pad = _round_up(n, t)
    nt = n_pad // t
    f_pad = _round_up(f, 128)
    h_pad = _round_up(h_dim, 128)
    e_pad = _round_up(e_dim, 128)

    bf16, f32 = jnp.bfloat16, jnp.float32

    def pad2(a, r, c, dtype):
        return jnp.pad(a, ((0, r - a.shape[0]), (0, c - a.shape[1]))).astype(dtype)

    a_p = pad2(adj, n_pad, n_pad, bf16)            # 0/1 entries: exact in bf16
    d_row = jnp.pad(d_inv_sqrt, (0, n_pad - n)).astype(f32).reshape(n_pad, 1)
    xs_p = pad2(x_scaled, n_pad, f_pad, bf16)
    w1_p = pad2(params["w1"], f_pad, h_pad, bf16)
    b1_p = pad2(params["b1"], 1, h_pad, f32)
    w2_p = pad2(params["w2"], h_pad, e_pad, bf16)
    b2_p = pad2(params["b2"], 1, e_pad, f32)
    wd1_p = pad2(params["wd1"], e_pad, h_pad, bf16)
    bd1_p = pad2(params["bd1"], 1, h_pad, f32)
    wd2_p = pad2(params["wd2"], h_pad, f_pad, bf16)
    bd2_p = pad2(params["bd2"], 1, f_pad, f32)

    resident = lambda r, c: pl.BlockSpec((r, c), lambda i, k: (0, 0))
    # 3-deep buffering on the streamed A tiles only when the K-loop is long
    # enough to benefit (keeps the tiny-graph path on the plain default).
    a_extra = dict(pipeline_mode=pl.Buffered(3)) if nt >= 3 else {}

    # -------------------- kernel 1: encoder layer 1 (+ @W2) --------------------
    ce1 = pl.CostEstimate(
        flops=2 * n_pad * n_pad * f_pad
              + 2 * n_pad * (f_pad * h_pad + h_pad * e_pad)
              + 3 * n_pad * (f_pad + e_pad),
        transcendentals=0,
        bytes_accessed=2 * n_pad * n_pad + 2 * n_pad * f_pad
                       + 2 * n_pad * e_pad + 4 * n_pad
                       + 2 * (f_pad * h_pad + h_pad * e_pad))
    hw2s = pl.pallas_call(
        enc1_kernel,
        out_shape=jax.ShapeDtypeStruct((n_pad, e_pad), bf16),
        grid_spec=pltpu.PrefetchScalarGridSpec(
            num_scalar_prefetch=0,
            grid=(nt, nt),
            in_specs=[
                pl.BlockSpec((t, t), lambda i, k: (i, k), **a_extra),  # A + I
                pl.BlockSpec((t, 1), lambda i, k: (i, 0)),             # d^-1/2 rows
                resident(n_pad, f_pad),                                # d*X resident
                resident(f_pad, h_pad),                                # W1
                resident(1, h_pad),                                    # b1
                resident(h_pad, e_pad),                                # W2
            ],
            out_specs=pl.BlockSpec((t, e_pad), lambda i, k: (i, 0)),
            scratch_shapes=[pltpu.VMEM((t, f_pad), f32)],
        ),
        compiler_params=pltpu.CompilerParams(
            dimension_semantics=("parallel", "arbitrary"),
            vmem_limit_bytes=vmem_limit_bytes),
        cost_estimate=ce1,
    )(a_p, d_row, xs_p, w1_p, b1_p, w2_p)

    # -------------- kernel 2: encoder layer 2 + node decoder -------------------
    ce2 = pl.CostEstimate(
        flops=2 * n_pad * n_pad * e_pad
              + 2 * n_pad * (e_pad * h_pad + h_pad * f_pad)
              + 3 * n_pad * (e_pad + f_pad),
        transcendentals=0,
        bytes_accessed=2 * n_pad * n_pad + 2 * n_pad * e_pad + 4 * n_pad
                       + 6 * n_pad * e_pad + 4 * n_pad * f_pad
                       + 2 * (e_pad * h_pad + h_pad * f_pad))
    z_pad, zb_pad, xrec_pad = pl.pallas_call(
        enc2_nodedec_kernel,
        out_shape=(jax.ShapeDtypeStruct((n_pad, e_pad), f32),
                   jax.ShapeDtypeStruct((n_pad, e_pad), bf16),
                   jax.ShapeDtypeStruct((n_pad, f_pad), f32)),
        grid_spec=pltpu.PrefetchScalarGridSpec(
            num_scalar_prefetch=0,
            grid=(nt, nt),
            in_specs=[
                pl.BlockSpec((t, t), lambda i, k: (i, k), **a_extra),  # A + I
                pl.BlockSpec((t, 1), lambda i, k: (i, 0)),             # d^-1/2 rows
                resident(n_pad, e_pad),                                # d*HW2 resident
                resident(1, e_pad),                                    # b2
                resident(e_pad, h_pad),                                # Wd1
                resident(1, h_pad),                                    # bd1
                resident(h_pad, f_pad),                                # Wd2
                resident(1, f_pad),                                    # bd2
            ],
            out_specs=(pl.BlockSpec((t, e_pad), lambda i, k: (i, 0)),
                       pl.BlockSpec((t, e_pad), lambda i, k: (i, 0)),
                       pl.BlockSpec((t, f_pad), lambda i, k: (i, 0))),
            scratch_shapes=[pltpu.VMEM((t, e_pad), f32)],
        ),
        compiler_params=pltpu.CompilerParams(
            dimension_semantics=("parallel", "arbitrary"),
            vmem_limit_bytes=vmem_limit_bytes),
        cost_estimate=ce2,
    )(a_p, d_row, hw2s, b2_p, wd1_p, bd1_p, wd2_p, bd2_p)

    # ---------------------- kernel 3: edge decoder -----------------------------
    ce3 = pl.CostEstimate(
        flops=2 * n_pad * n_pad * e_pad,
        transcendentals=2 * n_pad * n_pad,
        bytes_accessed=2 * n_pad * n_pad + 2 * n_pad * e_pad)
    adj_pad = pl.pallas_call(
        edge_dec_kernel,
        out_shape=jax.ShapeDtypeStruct((n_pad, n_pad), bf16),
        grid_spec=pltpu.PrefetchScalarGridSpec(
            num_scalar_prefetch=0,
            grid=(nt, nt),
            in_specs=[pl.BlockSpec((n_pad, e_pad), lambda i, j: (0, 0))],  # Z bf16
            out_specs=pl.BlockSpec((t, t), lambda i, j: (i, j)),
        ),
        compiler_params=pltpu.CompilerParams(
            dimension_semantics=("parallel", "parallel"),
            vmem_limit_bytes=vmem_limit_bytes),
        cost_estimate=ce3,
    )(zb_pad)

    # slice padding away (adj_recon stays bf16: store-bound kernel writes bf16)
    return z_pad[:n, :e_dim], xrec_pad[:n, :f], adj_pad[:n, :n]


def init_params(key, input_dim, hidden_dim, embedding_dim):
    ks = jax.random.split(key, 8)
    s = 0.1
    return {
        # GCNConv weights: (in_features, out_features); biases kept 2-D (1, out)
        "w1": s * jax.random.normal(ks[0], (input_dim, hidden_dim), jnp.float32),
        "b1": s * jax.random.normal(ks[1], (1, hidden_dim), jnp.float32),
        "w2": s * jax.random.normal(ks[2], (hidden_dim, embedding_dim), jnp.float32),
        "b2": s * jax.random.normal(ks[3], (1, embedding_dim), jnp.float32),
        # node decoder Linear layers
        "wd1": s * jax.random.normal(ks[4], (embedding_dim, hidden_dim), jnp.float32),
        "bd1": s * jax.random.normal(ks[5], (1, hidden_dim), jnp.float32),
        "wd2": s * jax.random.normal(ks[6], (hidden_dim, input_dim), jnp.float32),
        "bd2": s * jax.random.normal(ks[7], (1, input_dim), jnp.float32),
    }


def reference_forward(x, edge_index, params):
    """Pure-JAX f32 reference (same math as the PyTorch module, eval mode)."""
    n = x.shape[0]
    src, dst = edge_index[0], edge_index[1]
    adj = jnp.zeros((n, n), jnp.float32).at[src, dst].set(1.0)
    adj = adj.at[jnp.arange(n), jnp.arange(n)].set(1.0)
    deg = adj.sum(axis=1)
    dis = jnp.where(deg > 0, 1.0 / jnp.sqrt(deg), 0.0)
    a_hat = adj * dis[:, None] * dis[None, :]
    h = jnp.maximum(a_hat @ (x @ params["w1"]) + params["b1"], 0.0)
    z = a_hat @ (h @ params["w2"]) + params["b2"]
    d = jnp.maximum(z @ params["wd1"] + params["bd1"], 0.0)
    x_recon = d @ params["wd2"] + params["bd2"]
    adj_recon = jax.nn.sigmoid(z @ z.T)
    return z, x_recon, adj_recon


if __name__ == "__main__":
    num_nodes = 16
    input_dim = 16
    hidden_dim = 32
    embedding_dim = 8

    key = jax.random.PRNGKey(0)
    k_x, k_p = jax.random.split(key)

    # deterministic node features
    x = jax.random.normal(k_x, (num_nodes, input_dim), jnp.float32)

    # deterministic ring graph (bidirectional edges)
    src = jnp.arange(num_nodes, dtype=jnp.int32)
    dst = (src + 1) % num_nodes
    edge_index = jnp.stack(
        [jnp.concatenate([src, dst]), jnp.concatenate([dst, src])], axis=0
    )  # (2, 2*num_nodes)

    params = init_params(k_p, input_dim, hidden_dim, embedding_dim)

    z, x_recon, adj_recon = graph_autoencoder_forward(x, edge_index, params)
    jax.block_until_ready((z, x_recon, adj_recon))

    assert z.shape == (num_nodes, embedding_dim)
    assert x_recon.shape == (num_nodes, input_dim)
    assert adj_recon.shape == (num_nodes, num_nodes)

    # loose correctness check vs f32 reference (kernel uses bf16 MXU operands
    # and a bf16 adjacency-reconstruction output)
    z_r, xr_r, adj_r = reference_forward(x, edge_index, params)
    for name, got, want in (("z", z, z_r), ("x_recon", x_recon, xr_r),
                            ("adj_recon", adj_recon, adj_r)):
        got32 = got.astype(jnp.float32)
        assert bool(jnp.all(jnp.isfinite(got32))), name
        err = float(jnp.max(jnp.abs(got32 - want)))
        assert err < 5e-2, f"{name}: max abs err {err}"

    print("KERNEL_OK")
</pallas_src>

<mosaic_0001>
module attributes {stable_mosaic.version = 11 : i64} {
  func.func @enc1_kernel(%arg0: i32, %arg1: i32, %arg2: memref<128x128xbf16, #tpu.memory_space<vmem>>, %arg3: memref<128x1xf32, #tpu.memory_space<vmem>>, %arg4: memref<128x128xbf16, #tpu.memory_space<vmem>>, %arg5: memref<128x128xbf16, #tpu.memory_space<vmem>>, %arg6: memref<1x128xf32, #tpu.memory_space<vmem>>, %arg7: memref<128x128xbf16, #tpu.memory_space<vmem>>, %arg8: memref<128x128xbf16, #tpu.memory_space<vmem>>, %arg9: memref<128x128xf32, #tpu.memory_space<vmem>>) attributes {dimension_semantics = [#tpu.dimension_semantics<parallel>, #tpu.dimension_semantics<arbitrary>], iteration_bounds = array<i64: 1, 1>, scalar_prefetch = 0 : i64, scratch_operands = 1 : i64, tpu.core_type = #tpu.core_type<tc>, window_params = [{transform_indices = @transform_0, window_bounds = array<i64: 128, 128>}, {transform_indices = @transform_1, window_bounds = array<i64: 128, 1>}, {pipeline_mode = #tpu.pipeline_mode<synchronous>, transform_indices = @transform_2, window_bounds = array<i64: 128, 128>}, {pipeline_mode = #tpu.pipeline_mode<synchronous>, transform_indices = @transform_3, window_bounds = array<i64: 128, 128>}, {pipeline_mode = #tpu.pipeline_mode<synchronous>, transform_indices = @transform_4, window_bounds = array<i64: 1, 128>}, {pipeline_mode = #tpu.pipeline_mode<synchronous>, transform_indices = @transform_5, window_bounds = array<i64: 128, 128>}, {transform_indices = @transform_6, window_bounds = array<i64: 128, 128>}]} {
    %c0_i32 = arith.constant 0 : i32
    %0 = arith.cmpi eq, %arg1, %c0_i32 : i32
    %1 = arith.extui %0 : i1 to i32
    %c0_i32_0 = arith.constant 0 : i32
    %2 = arith.cmpi ne, %1, %c0_i32_0 : i32
    scf.if %2 {
      %cst_9 = arith.constant 0.000000e+00 : f32
      %15 = vector.broadcast %cst_9 : f32 to vector<128x128xf32>
      %c0_10 = arith.constant 0 : index
      %c0_11 = arith.constant 0 : index
      %16 = vector.load %arg9[%c0_10, %c0_11] : memref<128x128xf32, #tpu.memory_space<vmem>>, vector<128x128xf32>
      tpu.vector_store %arg9[%c0_10, %c0_11], %15 {strides = array<i32>} : memref<128x128xf32, #tpu.memory_space<vmem>>, vector<128x128xf32>,
    } else {
    }
    %c128_i32 = arith.constant 128 : i32
    %3 = arith.muli %arg1, %c128_i32 : i32
    %4 = tpu.assume_multiple %3, 128 : i32
    %c0 = arith.constant 0 : index
    %c0_1 = arith.constant 0 : index
    %5 = vector.load %arg9[%c0, %c0_1] : memref<128x128xf32, #tpu.memory_space<vmem>>, vector<128x128xf32>
    %c0_2 = arith.constant 0 : index
    %c0_3 = arith.constant 0 : index
    %6 = vector.load %arg2[%c0_2, %c0_3] : memref<128x128xbf16, #tpu.memory_space<vmem>>, vector<128x128xbf16>
    %7 = arith.index_cast %4 : i32 to index
    %c0_4 = arith.constant 0 : index
    %8 = vector.load %arg4[%7, %c0_4] : memref<128x128xbf16, #tpu.memory_space<vmem>>, vector<128x128xbf16>
    %cst = arith.constant dense<0.000000e+00> : vector<128x128xf32>
    %9 = tpu.matmul %6, %8, %cst {dimension_numbers = #tpu.dot_dimension_numbers<[1], [0], [0], [1], [0, 0, 1, 1], [], []>} : vector<128x128xbf16>, vector<128x128xbf16>, vector<128x128xf32> -> vector<128x128xf32>
    %10 = arith.addf %5, %9 : vector<128x128xf32>
    %c0_5 = arith.constant 0 : index
    %c0_6 = arith.constant 0 : index
    %11 = vector.load %arg9[%c0_5, %c0_6] : memref<128x128xf32, #tpu.memory_space<vmem>>, vector<128x128xf32>
    tpu.vector_store %arg9[%c0_5, %c0_6], %10 {strides = array<i32>} : memref<128x128xf32, #tpu.memory_space<vmem>>, vector<128x128xf32>,
    %c0_i32_7 = arith.constant 0 : i32
    %12 = arith.cmpi eq, %arg1, %c0_i32_7 : i32
    %13 = arith.extui %12 : i1 to i32
    %c0_i32_8 = arith.constant 0 : i32
    %14 = arith.cmpi ne, %13, %c0_i32_8 : i32
    scf.if %14 {
      %c0_9 = arith.constant 0 : index
      %c0_10 = arith.constant 0 : index
      %15 = vector.load %arg3[%c0_9, %c0_10] : memref<128x1xf32, #tpu.memory_space<vmem>>, vector<128x1xf32>
      %c0_11 = arith.constant 0 : index
      %c0_12 = arith.constant 0 : index
      %16 = vector.load %arg9[%c0_11, %c0_12] : memref<128x128xf32, #tpu.memory_space<vmem>>, vector<128x128xf32>
      %17 = vector.broadcast %15 : vector<128x1xf32> to vector<128x128xf32>
      %18 = arith.mulf %17, %16 : vector<128x128xf32>
      %19 = arith.truncf %18 : vector<128x128xf32> to vector<128x128xbf16>
      %c0_13 = arith.constant 0 : index
      %c0_14 = arith.constant 0 : index
      %20 = vector.load %arg5[%c0_13, %c0_14] : memref<128x128xbf16, #tpu.memory_space<vmem>>, vector<128x128xbf16>
      %cst_15 = arith.constant dense<0.000000e+00> : vector<128x128xf32>
      %21 = tpu.matmul %19, %20, %cst_15 {dimension_numbers = #tpu.dot_dimension_numbers<[1], [0], [0], [1], [0, 0, 1, 1], [], []>} : vector<128x128xbf16>, vector<128x128xbf16>, vector<128x128xf32> -> vector<128x128xf32>
      %c0_16 = arith.constant 0 : index
      %c0_17 = arith.constant 0 : index
      %22 = vector.load %arg6[%c0_16, %c0_17] : memref<1x128xf32, #tpu.memory_space<vmem>>, vector<1x128xf32>
      %23 = vector.broadcast %22 : vector<1x128xf32> to vector<128x128xf32>
      %24 = arith.addf %21, %23 : vector<128x128xf32>
      %cst_18 = arith.constant 0.000000e+00 : f32
      %25 = vector.broadcast %cst_18 : f32 to vector<128x128xf32>
      %26 = arith.maximumf %24, %25 : vector<128x128xf32>
      %27 = arith.truncf %26 : vector<128x128xf32> to vector<128x128xbf16>
      %c0_19 = arith.constant 0 : index
      %c0_20 = arith.constant 0 : index
      %28 = vector.load %arg7[%c0_19, %c0_20] : memref<128x128xbf16, #tpu.memory_space<vmem>>, vector<128x128xbf16>
      %cst_21 = arith.constant dense<0.000000e+00> : vector<128x128xf32>
      %29 = tpu.matmul %27, %28, %cst_21 {dimension_numbers = #tpu.dot_dimension_numbers<[1], [0], [0], [1], [0, 0, 1, 1], [], []>} : vector<128x128xbf16>, vector<128x128xbf16>, vector<128x128xf32> -> vector<128x128xf32>
      %30 = vector.broadcast %15 : vector<128x1xf32> to vector<128x128xf32>
      %31 = arith.mulf %30, %29 : vector<128x128xf32>
      %32 = arith.truncf %31 : vector<128x128xf32> to vector<128x128xbf16>
      %c0_22 = arith.constant 0 : index
      %c0_23 = arith.constant 0 : index
      %33 = vector.load %arg8[%c0_22, %c0_23] : memref<128x128xbf16, #tpu.memory_space<vmem>>, vector<128x128xbf16>
      tpu.vector_store %arg8[%c0_22, %c0_23], %32 {strides = array<i32>} : memref<128x128xbf16, #tpu.memory_space<vmem>>, vector<128x128xbf16>,
    } else {
    }
    return
  }
  func.func @transform_0(%arg0: i32, %arg1: i32) -> (i32, i32) {
    %c0_i32 = arith.constant 0 : i32
    return %arg0, %arg1 : i32, i32
  }
  func.func @transform_1(%arg0: i32, %arg1: i32) -> (i32, i32) {
    %c0_i32 = arith.constant 0 : i32
    %c0_i32_0 = arith.constant 0 : i32
    return %arg0, %c0_i32 : i32, i32
  }
  func.func @transform_2(%arg0: i32, %arg1: i32) -> (i32, i32) {
    %c0_i32 = arith.constant 0 : i32
    %c0_i32_0 = arith.constant 0 : i32
    %c0_i32_1 = arith.constant 0 : i32
    return %c0_i32, %c0_i32_0 : i32, i32
  }
  func.func @transform_3(%arg0: i32, %arg1: i32) -> (i32, i32) {
    %c0_i32 = arith.constant 0 : i32
    %c0_i32_0 = arith.constant 0 : i32
    %c0_i32_1 = arith.constant 0 : i32
    return %c0_i32, %c0_i32_0 : i32, i32
  }
  func.func @transform_4(%arg0: i32, %arg1: i32) -> (i32, i32) {
    %c0_i32 = arith.constant 0 : i32
    %c0_i32_0 = arith.constant 0 : i32
    %c0_i32_1 = arith.constant 0 : i32
    return %c0_i32, %c0_i32_0 : i32, i32
  }
  func.func @transform_5(%arg0: i32, %arg1: i32) -> (i32, i32) {
    %c0_i32 = arith.constant 0 : i32
    %c0_i32_0 = arith.constant 0 : i32
    %c0_i32_1 = arith.constant 0 : i32
    return %c0_i32, %c0_i32_0 : i32, i32
  }
  func.func @transform_6(%arg0: i32, %arg1: i32) -> (i32, i32) {
    %c0_i32 = arith.constant 0 : i32
    %c0_i32_0 = arith.constant 0 : i32
    return %arg0, %c0_i32 : i32, i32
  }
}

</mosaic_0001>

<bundles_post_ra>
// kernel: tpu_custom_call.1
= control target key start
LH: loop header
LB: loop body
LE: loop exit
PB: predicated region body
PF: predicated region fallthrough
CT: control target
= control target key end

     0   :  { %11 = vsyncpa [#allocation4], 0  ;;  %s1310_s0 = inlined_call_operand.vmem [shape: bf16[128,128], index: 0, kind: input, shape index: {}]   ;;  %s1311_s1 = inlined_call_operand.vmem [shape: f32[128,1], index: 1, kind: input, shape index: {}]   ;;  %s1312_s2 = inlined_call_operand.vmem [shape: bf16[128,128], index: 2, kind: input, shape index: {}]   ;;  %s1313_s3 = inlined_call_operand.hbm [shape: bf16[128,128], index: 3, kind: input, shape index: {}]   ;;  %s1314_s4 = inlined_call_operand.vmem [shape: f32[1,128], index: 4, kind: input, shape index: {}]   ;;  %s1315_s5 = inlined_call_operand.hbm [shape: bf16[128,128], index: 5, kind: input, shape index: {}]   ;;  %s1316_s6 = inlined_call_operand.hbm [shape: bf16[128,128], index: 6, kind: output, shape index: {}]  }
   0x1   :  { %12 = vsyncpa [#allocation7], 0 }
   0x2   :  { %13 = vsyncpa [#allocation5], 0  ;;  %s24_s23 = sshll.u32 %s1313_s3, 4  ;;  %s1088_s24 = smov [#allocation3]   ;;  %s25_s23 = int_to_ptr.hbm [resolvable:$true] %s24_s23 }
   0x3   :  { %s26_s25 = sshll.u32 %s1088_s24, 4  ;;  %s39_s28 = sshll.u32 %s1315_s5, 4  ;;  %s27_s25 = int_to_ptr.vmem [resolvable:$true] %s26_s25  ;;  %s40_s28 = int_to_ptr.hbm [resolvable:$true] %s39_s28 }
   0x4   :  { %s1089_s29 = smov 64   ;;  %s1090_s30 = smov 4  }
   0x5   :  { %32 = dma.hbm_to_vmem [thread:$0]  %s25_s23, 1024, %s27_s25, [#allocation4], %s1089_s29, %s1089_s29, %s1090_s30  }
   0x6   :  { %s1091_s7 = smov [#allocation6]  }
   0x7   :  { %s41_s8 = sshll.u32 %s1091_s7, 4  ;;  %s42_s8 = int_to_ptr.vmem [resolvable:$true] %s41_s8 }
   0x8   :  { %47 = dma.hbm_to_vmem [thread:$0]  %s40_s28, 1024, %s42_s8, [#allocation7], %s1089_s29, %s1089_s29, %s1090_s30  }
   0x9   :  { %1082 = dma.done.wait [#allocation4], 1024  }
   0xa   :  { %1083 = vsyncadd [#allocation4], 4294966272 }
   0xb   :  { %1084 = dma.done.wait [#allocation7], 1024  }
   0xc   :  { %1085 = vsyncadd [#allocation7], 4294966272  ;;  %v1092_v0 = vmov 0   ;;  %v912_v1 = vld [vmem:[%s1312_s2 + $0x38] sm:$0xff]  ;;  %v309_v2 = vld [vmem:[%s1311_s1] sm:$0xff]  ;;  %s753_s24 = sshll.u32 %s1316_s6, 4  ;;  %s754_s24 = int_to_ptr.hbm [resolvable:$true] %s753_s24 }
   0xd   :  { %1006 = vset.pattern.permute.xlu0 %v1092_v0  ;;  %1007 = vset.pattern.permute.xlu1 %v1092_v0  ;;  %v911_v3 = vld [vmem:[%s1312_s2 + $0x30] sm:$0xff]  ;;  %v910_v5 = vld [vmem:[%s1312_s2 + $0x28] sm:$0xff]  ;;  %v312_v7 = vld [vmem:[%s1311_s1 + $0x18] sm:$0xff] }
   0xe   :  { %1008 = vset.pattern.permute.xlu2 %v1092_v0  ;;  %343 = vperm.xlu0 %1006, %v309_v2   ;;  %v311_v4 = vld [vmem:[%s1311_s1 + $0x10] sm:$0xff]  ;;  %v310_v6 = vld [vmem:[%s1311_s1 + $0x8] sm:$0xff]  ;;  %v909_v8 = vld [vmem:[%s1312_s2 + $0x20] sm:$0xff] }
   0xf   :  { %225 = vmatpush.bf16.msra.mxu0 %v912_v1  ;;  %976 = vmatpush.bf16.msra.mxu3 %v912_v1  ;;  %v908_v9 = vld [vmem:[%s1312_s2 + $0x18] sm:$0xff]  ;;  %v315_v10 = vld [vmem:[%s1311_s1 + $0x30] sm:$0xff]  ;;  %v906_v13 = vld [vmem:[%s1312_s2 + $0x8] sm:$0xff] }
  0x10   :  { %353 = vperm.xlu1 %1007, %v311_v4   ;;  %v316_v11 = vld [vmem:[%s1311_s1 + $0x38] sm:$0xff]  ;;  %v907_v12 = vld [vmem:[%s1312_s2 + $0x10] sm:$0xff]  ;;  %v322_v14 = vld [vmem:[%s1311_s1 + $0x68] sm:$0xff] }
  0x11   :  { %v317_v15 = vld [vmem:[%s1311_s1 + $0x40] sm:$0xff]  ;;  %v903_v18 = vld [vmem:[%s1310_s0 + $0x30] sm:$0xff]  ;;  %v324_v20 = vld [vmem:[%s1311_s1 + $0x78] sm:$0xff] }
  0x12   :  { %v905_v16 = vld [vmem:[%s1312_s2] sm:$0xff]  ;;  %v323_v19 = vld [vmem:[%s1311_s1 + $0x70] sm:$0xff]  ;;  %v320_v22 = vld [vmem:[%s1311_s1 + $0x58] sm:$0xff] }
  0x13   :  { %226 = vmatpush.bf16.msra.mxu0 %v911_v3  ;;  %977 = vmatpush.bf16.msra.mxu3 %v911_v3  ;;  %v897_v17 = vld [vmem:[%s1310_s0] sm:$0xff]  ;;  %v314_v23 = vld [vmem:[%s1311_s1 + $0x28] sm:$0xff]  ;;  %v904_v25 = vld [vmem:[%s1310_s0 + $0x38] sm:$0xff] }
  0x14   :  { %v313_v21 = vld [vmem:[%s1311_s1 + $0x20] sm:$0xff]  ;;  %v898_v24 = vld [vmem:[%s1310_s0 + $0x8] sm:$0xff]  ;;  %v899_v28 = vld [vmem:[%s1310_s0 + $0x10] sm:$0xff] }
  0x15   :  { %363 = vperm.xlu2 %1008, %v313_v21   ;;  %v321_v26 = vld [vmem:[%s1311_s1 + $0x60] sm:$0xff]  ;;  %v318_v27 = vld [vmem:[%s1311_s1 + $0x48] sm:$0xff]  ;;  %v319_v29 = vld [vmem:[%s1311_s1 + $0x50] sm:$0xff] }
  0x16   :  { %348 = vperm.xlu0 %1006, %v310_v6   ;;  %v900_v30 = vld [vmem:[%s1310_s0 + $0x18] sm:$0xff]  ;;  %v901_v31 = vld [vmem:[%s1310_s0 + $0x20] sm:$0xff]  ;;  %v919_v33 = vld [vmem:[#allocation3 + $0x30] sm:$0xff] }
  0x17   :  { %227 = vmatpush.bf16.msra.mxu0 %v910_v5  ;;  %978 = vmatpush.bf16.msra.mxu3 %v910_v5  ;;  %v920_v32 = vld [vmem:[#allocation3 + $0x38] sm:$0xff]  ;;  %v902_v34 = vld [vmem:[%s1310_s0 + $0x28] sm:$0xff]  ;;  %v917_v36 = vld [vmem:[#allocation3 + $0x20] sm:$0xff] }
  0x18   :  { %358 = vperm.xlu1 %1007, %v312_v7   ;;  %513 = vmatpush.bf16.msra.mxu1 %v920_v32  ;;  %v918_v35 = vld [vmem:[#allocation3 + $0x28] sm:$0xff]  ;;  %v916_v37 = vld [vmem:[#allocation3 + $0x18] sm:$0xff]  ;;  %v915_v38 = vld [vmem:[#allocation3 + $0x10] sm:$0xff] }
  0x19   :  { %v914_v39 = vld [vmem:[#allocation3 + $0x8] sm:$0xff]  ;;  %v913_v40 = vld [vmem:[#allocation3] sm:$0xff]  ;;  %v927_v21 = vld [vmem:[#allocation6 + $0x30] sm:$0xff] }
  0x1b   :  { %228 = vmatpush.bf16.msra.mxu0 %v909_v8  ;;  %979 = vmatpush.bf16.msra.mxu3 %v909_v8 }
  0x1c   :  { %514 = vmatpush.bf16.msra.mxu1 %v919_v33 }
  0x1d   :  { %368 = vperm.xlu2 %1008, %v314_v23   ;;  %v926_v23 = vld [vmem:[#allocation6 + $0x28] sm:$0xff] }
  0x1e   :  { %373 = vperm.xlu0 %1006, %v315_v10  }
  0x1f   :  { %229 = vmatpush.bf16.msra.mxu0 %v908_v9  ;;  %980 = vmatpush.bf16.msra.mxu3 %v908_v9 }
  0x20   :  { %378 = vperm.xlu1 %1007, %v316_v11   ;;  %515 = vmatpush.bf16.msra.mxu1 %v918_v35 }
  0x23   :  { %230 = vmatpush.bf16.msra.mxu0 %v907_v12  ;;  %981 = vmatpush.bf16.msra.mxu3 %v907_v12 }
  0x24   :  { %516 = vmatpush.bf16.msra.mxu1 %v917_v36 }
  0x25   :  { %403 = vperm.xlu2 %1008, %v321_v26  }
  0x26   :  { %408 = vperm.xlu0 %1006, %v322_v14  }
  0x27   :  { %231 = vmatpush.bf16.msra.mxu0 %v906_v13  ;;  %982 = vmatpush.bf16.msra.mxu3 %v906_v13 }
  0x28   :  { %383 = vperm.xlu1 %1007, %v317_v15   ;;  %517 = vmatpush.bf16.msra.mxu1 %v916_v37 }
  0x2b   :  { %232 = vmatpush.bf16.msra.mxu0 %v905_v16  ;;  %983 = vmatpush.bf16.msra.mxu3 %v905_v16 }
  0x2c   :  { %518 = vmatpush.bf16.msra.mxu1 %v915_v38 }
  0x2d   :  { %388 = vperm.xlu2 %1008, %v318_v27  }
  0x2e   :  { %233 = vmatmul.bf16.vlgmr.msra.gmra.mxu0 %v897_v17  ;;  %263 = vmatmul.bf16.vlgmr.msra.gmra.mxu3 %v903_v18 }
  0x2f   :  { %413 = vperm.xlu0 %1006, %v323_v19   ;;  %984 = vmatpush.bf16.msrb.mxu3 %v920_v32 }
  0x30   :  { %418 = vperm.xlu1 %1007, %v324_v20   ;;  %519 = vmatpush.bf16.msra.mxu1 %v914_v39  ;;  %v928_v20 = vld [vmem:[#allocation6 + $0x38] sm:$0xff] }
  0x31   :  { %650 = vmatpush.bf16.msra.mxu2 %v928_v20 }
  0x33   :  { %985 = vmatpush.bf16.msrb.mxu3 %v919_v33 }
  0x34   :  { %520 = vmatpush.bf16.msra.mxu1 %v913_v40 }
  0x35   :  { %393 = vperm.xlu2 %1008, %v319_v29   ;;  %651 = vmatpush.bf16.msra.mxu2 %v927_v21 }
  0x37   :  { %398 = vperm.xlu0 %1006, %v320_v22   ;;  %986 = vmatpush.bf16.msrb.mxu3 %v918_v35 }
  0x39   :  { %652 = vmatpush.bf16.msra.mxu2 %v926_v23 }
  0x3b   :  { %987 = vmatpush.bf16.msrb.mxu3 %v917_v36 }
  0x3e   :  { %238 = vmatmul.bf16.gmra.mxu0 %v898_v24  ;;  %268 = vmatmul.bf16.gmra.mxu3 %v904_v25  ;;  %v925_v24 = vld [vmem:[#allocation6 + $0x20] sm:$0xff] }
  0x3f   :  { %988 = vmatpush.bf16.msrb.mxu3 %v916_v37  ;;  %653 = vmatpush.bf16.msra.mxu2 %v925_v24  ;;  %v924_v37 = vld [vmem:[#allocation6 + $0x18] sm:$0xff] }
  0x43   :  { %989 = vmatpush.bf16.msrb.mxu3 %v915_v38  ;;  %654 = vmatpush.bf16.msra.mxu2 %v924_v37  ;;  %v923_v38 = vld [vmem:[#allocation6 + $0x10] sm:$0xff] }
  0x47   :  { %990 = vmatpush.bf16.msrb.mxu3 %v914_v39  ;;  %655 = vmatpush.bf16.msra.mxu2 %v923_v38  ;;  %v922_v39 = vld [vmem:[#allocation6 + $0x8] sm:$0xff] }
  0x4b   :  { %991 = vmatpush.bf16.msrb.mxu3 %v913_v40  ;;  %656 = vmatpush.bf16.msra.mxu2 %v922_v39  ;;  %v921_v40 = vld [vmem:[#allocation6] sm:$0xff] }
  0x4e   :  { %243 = vmatmul.bf16.gmra.mxu0 %v899_v28 }
  0x4f   :  { %992 = vmatpush.bf16.msra.mxu3 %v928_v20  ;;  %657 = vmatpush.bf16.msra.mxu2 %v921_v40 }
  0x53   :  { %993 = vmatpush.bf16.msra.mxu3 %v927_v21 }
  0x57   :  { %994 = vmatpush.bf16.msra.mxu3 %v926_v23 }
  0x5b   :  { %995 = vmatpush.bf16.msra.mxu3 %v925_v24 }
  0x5e   :  { %248 = vmatmul.bf16.gmra.mxu0 %v900_v30 }
  0x5f   :  { %996 = vmatpush.bf16.msra.mxu3 %v924_v37 }
  0x63   :  { %997 = vmatpush.bf16.msra.mxu3 %v923_v38 }
  0x67   :  { %998 = vmatpush.bf16.msra.mxu3 %v922_v39 }
  0x6b   :  { %999 = vmatpush.bf16.msra.mxu3 %v921_v40 }
  0x6e   :  { %253 = vmatmul.bf16.gmra.mxu0 %v901_v31 }
  0x6f   :  { %v1241_v43 = vpop.permute.xlu2 %363 }
  0x77   :  { %v1247_v47 = vpop.permute.xlu2 %368 }
  0x7e   :  { %258 = vmatmul.bf16.gmra.mxu0 %v902_v34 }
  0x7f   :  { %v1255_v54 = vpop.permute.xlu2 %403 }
  0x80   :  { %v1237_v41 = vpop.permute.xlu0 %343 }
  0x82   :  { %v1239_v42 = vpop.permute.xlu1 %353 }
  0x87   :  { %v1275_v25 = vpop.permute.xlu2 %388 }
  0x88   :  { %v1243_v44 = vpop.permute.xlu0 %348 }
  0x8a   :  { %v1245_v45 = vpop.permute.xlu1 %358 }
  0x8f   :  { %v1281_v32 = vpop.permute.xlu2 %393 }
  0x90   :  { %v1249_v48 = vpop.permute.xlu0 %373 }
  0x92   :  { %v1253_v53 = vpop.permute.xlu1 %378 }
  0x98   :  { %v1258_v57 = vpop.permute.xlu0 %408 }
  0x9a   :  { %v1261_v62 = vpop.permute.xlu1 %383 }
  0xa1   :  { %v1265_v4 = vpop.permute.xlu0 %413 }
  0xa2   :  { %v1267_v5 = vpop.permute.xlu1 %418 }
  0xa9   :  { %v1279_v31 = vpop.permute.xlu0 %398 }
  0xab   :  { %v234_v46 = vpop.f32.mrf.mxu0 }
  0xac   :  { %v421_v51 = vmul.f32 %v1237_v41, %v234_v46 }
  0xb1   :  { %v264_v49 = vpop.f32.mrf.mxu3 }
  0xb2   :  { %v433_v56 = vmul.f32 %v1255_v54, %v264_v49  ;;  %v1009_v49 = vld [vmem:[%s1314_s4] ss:$0 sm:$0xff]  ;;  %s1093_s4 = smov [#allocation8]  }
  0xb3   :  { %v236_v50 = vpop.f32.mrf.mxu0  ;;  %s751_s22 = sshll.u32 %s1093_s4, 4  ;;  %s752_s22 = int_to_ptr.vmem [resolvable:$true] %s751_s22 }
  0xb4   :  { %v422_v52 = vmul.f32 %v1243_v44, %v236_v50 }
  0xb6   :  { %v437_v55 = vpack.c.bf16 %v422_v52, %v421_v51 }
  0xb8   :  { %521 = vmatmul.bf16.vlgmr.msra.gmra.mxu1 %v437_v55 }
  0xb9   :  { %v266_v58 = vpop.f32.mrf.mxu3 }
  0xba   :  { %v434_v59 = vmul.f32 %v1258_v57, %v266_v58 }
  0xbb   :  { %v239_v60 = vpop.f32.mrf.mxu0 }
  0xbc   :  { %v443_v61 = vpack.c.bf16 %v434_v59, %v433_v56  ;;  %v423_v1 = vmul.f32 %v1239_v42, %v239_v60 }
  0xbe   :  { %551 = vmatmul.bf16.vlgmr.msrb.gmra.mxu3 %v443_v61 }
  0xc1   :  { %v269_v63 = vpop.f32.mrf.mxu3 }
  0xc2   :  { %v435_v7 = vmul.f32 %v1265_v4, %v269_v63 }
  0xc3   :  { %v241_v0 = vpop.f32.mrf.mxu0 }
  0xc4   :  { %v424_v2 = vmul.f32 %v1245_v45, %v241_v0 }
  0xc6   :  { %v438_v3 = vpack.c.bf16 %v424_v2, %v423_v1 }
  0xc8   :  { %526 = vmatmul.bf16.gmra.mxu1 %v438_v3 }
  0xc9   :  { %v271_v6 = vpop.f32.mrf.mxu3 }
  0xca   :  { %v436_v8 = vmul.f32 %v1267_v5, %v271_v6 }
  0xcb   :  { %v244_v9 = vpop.f32.mrf.mxu0 }
  0xcc   :  { %v444_v10 = vpack.c.bf16 %v436_v8, %v435_v7  ;;  %v425_v12 = vmul.f32 %v1241_v43, %v244_v9 }
  0xce   :  { %556 = vmatmul.bf16.gmra.mxu3 %v444_v10 }
  0xd3   :  { %v246_v11 = vpop.f32.mrf.mxu0 }
  0xd4   :  { %v426_v13 = vmul.f32 %v1247_v47, %v246_v11 }
  0xd6   :  { %v439_v14 = vpack.c.bf16 %v426_v13, %v425_v12 }
  0xd8   :  { %531 = vmatmul.bf16.gmra.mxu1 %v439_v14 }
  0xdb   :  { %v249_v15 = vpop.f32.mrf.mxu0 }
  0xdc   :  { %v427_v17 = vmul.f32 %v1249_v48, %v249_v15 }
  0xe3   :  { %v251_v16 = vpop.f32.mrf.mxu0 }
  0xe4   :  { %v428_v18 = vmul.f32 %v1253_v53, %v251_v16 }
  0xe6   :  { %v440_v19 = vpack.c.bf16 %v428_v18, %v427_v17 }
  0xe8   :  { %536 = vmatmul.bf16.gmra.mxu1 %v440_v19 }
  0xeb   :  { %v254_v22 = vpop.f32.mrf.mxu0 }
  0xec   :  { %v429_v27 = vmul.f32 %v1261_v62, %v254_v22 }
  0xf3   :  { %v256_v26 = vpop.f32.mrf.mxu0 }
  0xf4   :  { %v430_v28 = vmul.f32 %v1275_v25, %v256_v26 }
  0xf6   :  { %v441_v29 = vpack.c.bf16 %v430_v28, %v429_v27 }
  0xf8   :  { %541 = vmatmul.bf16.gmra.mxu1 %v441_v29 }
  0xfb   :  { %v259_v30 = vpop.f32.mrf.mxu0 }
  0xfc   :  { %v431_v34 = vmul.f32 %v1281_v32, %v259_v30 }
 0x103   :  { %v261_v33 = vpop.f32.mrf.mxu0 }
 0x104   :  { %v432_v35 = vmul.f32 %v1279_v31, %v261_v33 }
 0x106   :  { %v442_v36 = vpack.c.bf16 %v432_v35, %v431_v34 }
 0x108   :  { %546 = vmatmul.bf16.gmra.mxu1 %v442_v36 }
 0x135   :  { %v522_v46 = vpop.f32.mrf.mxu1 }
 0x136   :  { %v523_v50 = vadd.f32 %v1009_v49, %v522_v46 }
 0x138   :  { %v562_v55 = vmax.f32 %v523_v50, 0.0 }
 0x13d   :  { %v524_v51 = vpop.f32.mrf.mxu1 }
 0x13e   :  { %v525_v52 = vadd.f32 %v1009_v49, %v524_v51 }
 0x140   :  { %v563_v56 = vmax.f32 %v525_v52, 0.0 }
 0x141   :  { %v552_v58 = vpop.f32.mrf.mxu3 }
 0x142   :  { %v578_v59 = vpack.c.bf16 %v563_v56, %v562_v55  ;;  %v553_v61 = vadd.f32 %v1009_v49, %v552_v58 }
 0x144   :  { %658 = vmatmul.bf16.vlgmr.msra.gmra.mxu2 %v578_v59  ;;  %v574_v1 = vmax.f32 %v553_v61, 0.0 }
 0x145   :  { %v527_v60 = vpop.f32.mrf.mxu1 }
 0x146   :  { %v528_v2 = vadd.f32 %v1009_v49, %v527_v60 }
 0x148   :  { %v564_v9 = vmax.f32 %v528_v2, 0.0 }
 0x149   :  { %v554_v63 = vpop.f32.mrf.mxu3 }
 0x14a   :  { %v555_v0 = vadd.f32 %v1009_v49, %v554_v63 }
 0x14c   :  { %v575_v3 = vmax.f32 %v555_v0, 0.0 }
 0x14d   :  { %v529_v6 = vpop.f32.mrf.mxu1 }
 0x14e   :  { %v584_v7 = vpack.c.bf16 %v575_v3, %v574_v1  ;;  %v530_v8 = vadd.f32 %v1009_v49, %v529_v6 }
 0x150   :  { %v565_v10 = vmax.f32 %v530_v8, 0.0  ;;  %688 = vmatmul.bf16.vlgmr.msra.gmra.mxu3 %v584_v7 }
 0x151   :  { %v557_v11 = vpop.f32.mrf.mxu3 }
 0x152   :  { %v579_v12 = vpack.c.bf16 %v565_v10, %v564_v9  ;;  %v558_v14 = vadd.f32 %v1009_v49, %v557_v11 }
 0x154   :  { %663 = vmatmul.bf16.gmra.mxu2 %v579_v12  ;;  %v576_v17 = vmax.f32 %v558_v14, 0.0 }
 0x155   :  { %v532_v13 = vpop.f32.mrf.mxu1 }
 0x156   :  { %v533_v18 = vadd.f32 %v1009_v49, %v532_v13 }
 0x158   :  { %v566_v23 = vmax.f32 %v533_v18, 0.0 }
 0x159   :  { %v559_v15 = vpop.f32.mrf.mxu3 }
 0x15a   :  { %v560_v16 = vadd.f32 %v1009_v49, %v559_v15 }
 0x15c   :  { %v577_v19 = vmax.f32 %v560_v16, 0.0 }
 0x15d   :  { %v534_v20 = vpop.f32.mrf.mxu1 }
 0x15e   :  { %v535_v21 = vadd.f32 %v1009_v49, %v534_v20  ;;  %v585_v22 = vpack.c.bf16 %v577_v19, %v576_v17 }
 0x160   :  { %v567_v24 = vmax.f32 %v535_v21, 0.0  ;;  %693 = vmatmul.bf16.gmra.mxu3 %v585_v22 }
 0x162   :  { %v580_v26 = vpack.c.bf16 %v567_v24, %v566_v23 }
 0x164   :  { %668 = vmatmul.bf16.gmra.mxu2 %v580_v26 }
 0x165   :  { %v537_v27 = vpop.f32.mrf.mxu1 }
 0x166   :  { %v538_v28 = vadd.f32 %v1009_v49, %v537_v27 }
 0x168   :  { %v568_v33 = vmax.f32 %v538_v28, 0.0 }
 0x16d   :  { %v539_v29 = vpop.f32.mrf.mxu1 }
 0x16e   :  { %v540_v30 = vadd.f32 %v1009_v49, %v539_v29 }
 0x170   :  { %v569_v34 = vmax.f32 %v540_v30, 0.0 }
 0x172   :  { %v581_v35 = vpack.c.bf16 %v569_v34, %v568_v33 }
 0x174   :  { %673 = vmatmul.bf16.gmra.mxu2 %v581_v35 }
 0x175   :  { %v542_v36 = vpop.f32.mrf.mxu1 }
 0x176   :  { %v543_v37 = vadd.f32 %v1009_v49, %v542_v36 }
 0x178   :  { %v570_v40 = vmax.f32 %v543_v37, 0.0 }
 0x17d   :  { %v544_v38 = vpop.f32.mrf.mxu1 }
 0x17e   :  { %v545_v39 = vadd.f32 %v1009_v49, %v544_v38 }
 0x180   :  { %v571_v46 = vmax.f32 %v545_v39, 0.0 }
 0x182   :  { %v582_v50 = vpack.c.bf16 %v571_v46, %v570_v40 }
 0x184   :  { %678 = vmatmul.bf16.gmra.mxu2 %v582_v50 }
 0x185   :  { %v547_v51 = vpop.f32.mrf.mxu1 }
 0x186   :  { %v548_v52 = vadd.f32 %v1009_v49, %v547_v51 }
 0x188   :  { %v572_v58 = vmax.f32 %v548_v52, 0.0 }
 0x18d   :  { %v549_v55 = vpop.f32.mrf.mxu1 }
 0x18e   :  { %v550_v56 = vadd.f32 %v1009_v49, %v549_v55 }
 0x190   :  { %v573_v59 = vmax.f32 %v550_v56, 0.0 }
 0x192   :  { %v583_v60 = vpack.c.bf16 %v573_v59, %v572_v58 }
 0x194   :  { %683 = vmatmul.bf16.gmra.mxu2 %v583_v60 }
 0x1c7   :  { %v659_v61 = vpop.f32.mrf.mxu2 }
 0x1c8   :  { %v699_v0 = vmul.f32 %v659_v61, %v1237_v41 }
 0x1cf   :  { %v661_v63 = vpop.f32.mrf.mxu2 }
 0x1d0   :  { %v700_v1 = vmul.f32 %v661_v63, %v1243_v44 }
 0x1d2   :  { %v932_v2 = vpack.c.bf16 %v700_v1, %v699_v0 }
 0x1d3   :  { %v689_v3 = vpop.f32.mrf.mxu3 }
 0x1d4   :  { %933 = vst [vmem:[#allocation8] sm:$0xff] %v932_v2   ;;  %v711_v8 = vmul.f32 %v689_v3, %v1255_v54 }
 0x1d7   :  { %v664_v6 = vpop.f32.mrf.mxu2 }
 0x1d8   :  { %v701_v11 = vmul.f32 %v664_v6, %v1239_v42 }
 0x1db   :  { %v691_v7 = vpop.f32.mrf.mxu3 }
 0x1dc   :  { %v712_v9 = vmul.f32 %v691_v7, %v1258_v57 }
 0x1de   :  { %v962_v49 = vpack.c.bf16 %v712_v9, %v711_v8 }
 0x1df   :  { %v666_v10 = vpop.f32.mrf.mxu2 }
 0x1e0   :  { %974 = vst [vmem:[#allocation8 + $0x30] sm:$0xff] %v962_v49   ;;  %v702_v12 = vmul.f32 %v666_v10, %v1245_v45 }
 0x1e2   :  { %v937_v13 = vpack.c.bf16 %v702_v12, %v701_v11 }
 0x1e3   :  { %v694_v41 = vpop.f32.mrf.mxu3 }
 0x1e4   :  { %969 = vst [vmem:[#allocation8 + $0x8] sm:$0xff] %v937_v13   ;;  %v713_v15 = vmul.f32 %v694_v41, %v1265_v4 }
 0x1e7   :  { %v669_v44 = vpop.f32.mrf.mxu2 }
 0x1e8   :  { %v703_v57 = vmul.f32 %v669_v44, %v1241_v43 }
 0x1eb   :  { %v696_v14 = vpop.f32.mrf.mxu3 }
 0x1ec   :  { %v714_v16 = vmul.f32 %v696_v14, %v1267_v5 }
 0x1ee   :  { %v967_v17 = vpack.c.bf16 %v714_v16, %v713_v15 }
 0x1ef   :  { %v671_v54 = vpop.f32.mrf.mxu2 }
 0x1f0   :  { %975 = vst [vmem:[#allocation8 + $0x38] sm:$0xff] %v967_v17   ;;  %v704_v18 = vmul.f32 %v671_v54, %v1247_v47 }
 0x1f2   :  { %v942_v42 = vpack.c.bf16 %v704_v18, %v703_v57 }
 0x1f4   :  { %970 = vst [vmem:[#allocation8 + $0x10] sm:$0xff] %v942_v42  }
 0x1f7   :  { %v674_v19 = vpop.f32.mrf.mxu2 }
 0x1f8   :  { %v705_v20 = vmul.f32 %v674_v19, %v1249_v48 }
 0x1ff   :  { %v676_v45 = vpop.f32.mrf.mxu2 }
 0x200   :  { %v706_v21 = vmul.f32 %v676_v45, %v1253_v53 }
 0x202   :  { %v947_v22 = vpack.c.bf16 %v706_v21, %v705_v20 }
 0x204   :  { %971 = vst [vmem:[#allocation8 + $0x18] sm:$0xff] %v947_v22  }
 0x207   :  { %v679_v4 = vpop.f32.mrf.mxu2 }
 0x208   :  { %v707_v5 = vmul.f32 %v679_v4, %v1261_v62 }
 0x20f   :  { %v681_v23 = vpop.f32.mrf.mxu2 }
 0x210   :  { %v708_v24 = vmul.f32 %v681_v23, %v1275_v25 }
 0x212   :  { %v952_v43 = vpack.c.bf16 %v708_v24, %v707_v5 }
 0x214   :  { %972 = vst [vmem:[#allocation8 + $0x20] sm:$0xff] %v952_v43  }
 0x217   :  { %v684_v26 = vpop.f32.mrf.mxu2 }
 0x218   :  { %v709_v48 = vmul.f32 %v684_v26, %v1281_v32 }
 0x21f   :  { %v686_v47 = vpop.f32.mrf.mxu2 }
 0x220   :  { %v710_v53 = vmul.f32 %v686_v47, %v1279_v31 }
 0x222   :  { %v957_v27 = vpack.c.bf16 %v710_v53, %v709_v48 }
 0x224   :  { %973 = vst [vmem:[#allocation8 + $0x28] sm:$0xff] %v957_v27  }
 0x225   :  { %759 = dma.vmem_to_hbm [thread:$0]  %s752_s22, 1024, %s754_s24, [#allocation5], %s1089_s29, %s1089_s29, %s1090_s30  }
 0x226   :  { %1086 = dma.done.wait [#allocation5], 1024  }
 0x227   :  { %1087 = vsyncadd [#allocation5], 4294966272 }
 0x228   :  { %764 = vsyncpa [#allocation4], 1 }
 0x229   :  { %765 = vsyncpa [#allocation7], 1 }
 0x22a   :  { %766 = vsyncpa [#allocation5], 1 }

</bundles_post_ra>
